<compile_context>
chip_gen: v6e
topology: v6e:2x2x1
jax: 0.10.0
libtpu: 0.0.40
codegen_flags: <defaults>
</compile_context>

<pallas_src>
import functools
import math

import jax
import jax.numpy as jnp
import numpy as np
from jax.experimental import pallas as pl
from jax.experimental.pallas import tpu as pltpu


# ----------------------------------------------------------------------------
# Parameter setup (deterministic, matches SSIMLoss.create_window)
# ----------------------------------------------------------------------------
def gaussian_window(window_size: int, sigma: float = 1.5) -> np.ndarray:
    g = np.array(
        [math.exp(-((x - window_size // 2) ** 2) / float(2 * sigma ** 2))
         for x in range(window_size)],
        dtype=np.float32,
    )
    return g / g.sum()


def _round_up(x: int, m: int) -> int:
    return ((x + m - 1) // m) * m


# ----------------------------------------------------------------------------
# Pallas kernel: one (TR, Lp) row block -> 5 banded convs + SSIM + masked sum
# ----------------------------------------------------------------------------
def _ssim_kernel(p_ref, t_ref, out_ref, *, window, pad, n_rows, n_cols,
                 block_rows, has_row_pad):
    p = p_ref[...]                      # (TR, Lp) float32
    t = t_ref[...]
    lp = p.shape[-1]                    # static

    # ---- 5 depthwise Gaussian convs via shift-and-accumulate ---------------
    # Center tap (no roll).
    w0 = window[pad]
    mu1 = w0 * p
    mu2 = w0 * t
    s11 = w0 * (p * p)
    s22 = w0 * (t * t)
    s12 = w0 * (p * t)

    # Symmetric tap pairs +/-d.  Only p and t are rolled (XLU slot); the
    # squared / cross terms are rebuilt from the rolled copies on the VPU
    # (roll(x*y) == roll(x)*roll(y)), and the symmetric weight w[pad+d] ==
    # w[pad-d] is applied once per pair.  The >= pad zero columns in [L, Lp)
    # make the circular rolls reproduce conv1d's zero padding exactly on every
    # valid column (padded columns are masked out of the reduction below).
    for d in range(1, pad + 1):
        wd = window[pad + d]
        p_pos = pltpu.roll(p, d % lp, axis=1)
        p_neg = pltpu.roll(p, (-d) % lp, axis=1)
        t_pos = pltpu.roll(t, d % lp, axis=1)
        t_neg = pltpu.roll(t, (-d) % lp, axis=1)

        mu1 = mu1 + wd * (p_pos + p_neg)
        mu2 = mu2 + wd * (t_pos + t_neg)
        s11 = s11 + wd * (p_pos * p_pos + p_neg * p_neg)
        s22 = s22 + wd * (t_pos * t_pos + t_neg * t_neg)
        s12 = s12 + wd * (p_pos * t_pos + p_neg * t_neg)

    # ---- SSIM map -----------------------------------------------------------
    mu1_sq = mu1 * mu1
    mu2_sq = mu2 * mu2
    mu1_mu2 = mu1 * mu2
    sigma1_sq = s11 - mu1_sq
    sigma2_sq = s22 - mu2_sq
    sigma12 = s12 - mu1_mu2

    C1 = 0.01 ** 2
    C2 = 0.03 ** 2
    num = (2.0 * mu1_mu2 + C1) * (2.0 * sigma12 + C2)
    den = (mu1_sq + mu2_sq + C1) * (sigma1_sq + sigma2_sq + C2)
    # EUP approx reciprocal + one Newton-Raphson step: relative error
    # ~(approx err)^2, comfortably inside the 1e-4/1e-5 tolerance while the
    # divide leaves the (already loaded) VALU.
    inv = pl.reciprocal(den, approx=True)
    inv = inv * (2.0 - den * inv)
    ssim_map = num * inv

    # ---- masked block reduction --------------------------------------------
    # Column mask is block-invariant: one (1, Lp) row, one broadcast multiply.
    if n_cols < lp:
        cols = jax.lax.broadcasted_iota(jnp.int32, (1, lp), 1)
        masked = ssim_map * (cols < n_cols).astype(jnp.float32)
    else:
        masked = ssim_map

    # Row mask only exists at all (statically) when R was padded up to Rp; it
    # is one (TR, 1) broadcast multiply.
    if has_row_pad:
        row0 = pl.program_id(0) * block_rows
        rows = jax.lax.broadcasted_iota(jnp.int32, (block_rows, 1), 0) + row0
        masked = masked * (rows < n_rows).astype(jnp.float32)

    # Sublane-first reduce (VPU) to a single (1, Lp) row, then lane reduce.
    lane_partial = jnp.sum(masked, axis=0, keepdims=True)
    block_sum = jnp.sum(lane_partial)

    # Lane-dense partial-sum output (one unmasked 128-wide store per block).
    out_ref[...] = jnp.full((1, 1, 128), block_sum, dtype=jnp.float32)


# ----------------------------------------------------------------------------
# Wrapper: padding, row tiling, pallas_call, final reduction
# ----------------------------------------------------------------------------
def ssim_loss(pred, target, window_size: int = 11, block_rows=None):
    """pred, target: (B, C, L).  Returns scalar mean(1 - ssim_map) like SSIMLoss."""
    assert pred.shape == target.shape and pred.ndim == 3
    # The roll-based conv relies on the window being symmetric (odd length).
    assert window_size % 2 == 1, "window_size must be odd (symmetric window)"
    B, C, L = pred.shape
    R = B * C
    pad = window_size // 2
    win = gaussian_window(window_size)

    # Lane padding: multiple of 128, with at least `pad` zero columns of slack
    # so circular lane-rolls never wrap real data into valid outputs.
    Lp = _round_up(L + pad, 128)

    # ---- VMEM-aware row-tile sizing -----------------------------------------
    # Peak live set per block ~ (2 inputs x 2 pipeline buffers) + ~14 full-tile
    # f32 temporaries (p, t, 5 accumulators, 4 rolled copies, ssim temps)
    # ~= 20 x TR*Lp*4 bytes.  Budget against the per-generation VMEM capacity
    # (v5e/v6e: 128 MiB, v7x: 64 MiB per TensorCore).
    try:
        vmem_cap = int(pltpu.get_tpu_info().vmem_capacity_bytes)
    except Exception:
        vmem_cap = 64 << 20                      # v7x is the most restrictive
    vmem_limit = max(32 << 20, min((vmem_cap * 3) // 4, 100 << 20))
    tile_bytes_cap = vmem_limit // 20            # per-(TR, Lp)-tile budget

    if block_rows is None:
        rows_cap = max(8, (tile_bytes_cap // (Lp * 4)) // 8 * 8)
        TR = min(512, rows_cap, _round_up(R, 8))
        # Keep >= 2 row blocks when there is enough work so the "parallel"
        # grid axis actually splits across v7x's two TensorCores.
        if R >= 16:
            TR = min(TR, _round_up((R + 1) // 2, 8))
    else:
        TR = max(8, (int(block_rows) // 8) * 8)
    Rp = _round_up(R, TR)
    G = Rp // TR

    # TODO(synk): the wrapper-side jnp.pad re-reads/re-writes both inputs in
    # HBM; it only matters once the kernel becomes HBM-bound (MXU path).
    p2 = jnp.pad(pred.reshape(R, L).astype(jnp.float32),
                 ((0, Rp - R), (0, Lp - L)))
    t2 = jnp.pad(target.reshape(R, L).astype(jnp.float32),
                 ((0, Rp - R), (0, Lp - L)))

    kernel = functools.partial(
        _ssim_kernel,
        window=[float(w) for w in win],
        pad=pad, n_rows=R, n_cols=L, block_rows=TR,
        has_row_pad=(Rp > R))

    partial_sums = pl.pallas_call(
        kernel,
        out_shape=jax.ShapeDtypeStruct((G, 1, 128), jnp.float32),
        grid_spec=pltpu.PrefetchScalarGridSpec(
            num_scalar_prefetch=0,
            grid=(G,),
            in_specs=[
                pl.BlockSpec((TR, Lp), lambda i: (i, 0)),
                pl.BlockSpec((TR, Lp), lambda i: (i, 0)),
            ],
            out_specs=pl.BlockSpec((1, 1, 128), lambda i: (i, 0, 0)),
        ),
        compiler_params=pltpu.CompilerParams(
            # Row blocks are independent -> shard across v7x's 2 TensorCores.
            dimension_semantics=("parallel",),
            vmem_limit_bytes=int(vmem_limit),
        ),
    )(p2, t2)

    total = jnp.sum(partial_sums[:, 0, 0])
    # Fold the (1 - x) out of the per-element map: loss = 1 - mean(ssim_map).
    return 1.0 - total / (R * L)


# ----------------------------------------------------------------------------
# Pure-JAX reference (mirrors the PyTorch forward exactly) for a sanity check
# ----------------------------------------------------------------------------
def _ssim_loss_ref(pred, target, window_size=11):
    B, C, L = pred.shape
    win = jnp.asarray(gaussian_window(window_size))
    pad = window_size // 2

    def conv(x):  # depthwise "same" conv with the shared Gaussian window
        xp = jnp.pad(x, ((0, 0), (0, 0), (pad, pad)))
        cols = jnp.stack([xp[:, :, k:k + L] for k in range(window_size)], axis=-1)
        return jnp.einsum("bclk,k->bcl", cols, win)

    mu1, mu2 = conv(pred), conv(target)
    mu1_sq, mu2_sq, mu1_mu2 = mu1 * mu1, mu2 * mu2, mu1 * mu2
    s1 = conv(pred * pred) - mu1_sq
    s2 = conv(target * target) - mu2_sq
    s12 = conv(pred * target) - mu1_mu2
    C1, C2 = 0.01 ** 2, 0.03 ** 2
    ssim_map = ((2 * mu1_mu2 + C1) * (2 * s12 + C2)) / (
        (mu1_sq + mu2_sq + C1) * (s1 + s2 + C2)
    )
    return jnp.mean(1.0 - ssim_map)


if __name__ == "__main__":
    key = jax.random.PRNGKey(0)
    k1, k2, k3, k4 = jax.random.split(key, 4)

    # Case 1: shape implied by the module (batch=2, channels=4, length=16).
    B, C, L = 2, 4, 16
    pred = jax.random.normal(k1, (B, C, L), dtype=jnp.float32)
    target = jax.random.normal(k2, (B, C, L), dtype=jnp.float32)
    out = jax.block_until_ready(ssim_loss(pred, target, window_size=11))
    ref = _ssim_loss_ref(pred, target, window_size=11)
    assert jnp.allclose(out, ref, rtol=1e-4, atol=1e-5), (out, ref)

    # Case 2: rows and length that exercise the row/column padding masks.
    pred2 = jax.random.normal(k3, (2, 3, 50), dtype=jnp.float32)
    target2 = jax.random.normal(k4, (2, 3, 50), dtype=jnp.float32)
    out2 = jax.block_until_ready(ssim_loss(pred2, target2, window_size=11))
    ref2 = _ssim_loss_ref(pred2, target2, window_size=11)
    assert jnp.allclose(out2, ref2, rtol=1e-4, atol=1e-5), (out2, ref2)

    # Case 3: force multiple row blocks to exercise the pipelined "parallel"
    # grid and the partial-sum reduction path.
    pred3 = jax.random.normal(k1, (4, 4, 16), dtype=jnp.float32)
    target3 = jax.random.normal(k2, (4, 4, 16), dtype=jnp.float32)
    out3 = jax.block_until_ready(ssim_loss(pred3, target3, block_rows=8))
    ref3 = _ssim_loss_ref(pred3, target3, window_size=11)
    assert jnp.allclose(out3, ref3, rtol=1e-4, atol=1e-5), (out3, ref3)

    # Case 4: default tiling on a larger problem (>=2 blocks via the megacore
    # cap, row and column padding both active).
    pred4 = jax.random.normal(k3, (3, 7, 200), dtype=jnp.float32)
    target4 = jax.random.normal(k4, (3, 7, 200), dtype=jnp.float32)
    out4 = jax.block_until_ready(ssim_loss(pred4, target4, window_size=11))
    ref4 = _ssim_loss_ref(pred4, target4, window_size=11)
    assert jnp.allclose(out4, ref4, rtol=1e-4, atol=1e-5), (out4, ref4)

    print("KERNEL_OK")
</pallas_src>

<mosaic_0001>
module attributes {stable_mosaic.version = 11 : i64} {
  func.func @_ssim_kernel(%arg0: i32, %arg1: memref<8x128xf32, #tpu.memory_space<vmem>>, %arg2: memref<8x128xf32, #tpu.memory_space<vmem>>, %arg3: memref<1x1x128xf32, #tpu.memory_space<vmem>>) attributes {dimension_semantics = [#tpu.dimension_semantics<parallel>], iteration_bounds = array<i64: 1>, scalar_prefetch = 0 : i64, scratch_operands = 0 : i64, tpu.core_type = #tpu.core_type<tc>, window_params = [{transform_indices = @transform_0, window_bounds = array<i64: 8, 128>}, {transform_indices = @transform_1, window_bounds = array<i64: 8, 128>}, {transform_indices = @transform_2, window_bounds = array<i64: 1, 1, 128>}]} {
    %c0 = arith.constant 0 : index
    %c0_0 = arith.constant 0 : index
    %0 = vector.load %arg1[%c0, %c0_0] : memref<8x128xf32, #tpu.memory_space<vmem>>, vector<8x128xf32>
    %c0_1 = arith.constant 0 : index
    %c0_2 = arith.constant 0 : index
    %1 = vector.load %arg2[%c0_1, %c0_2] : memref<8x128xf32, #tpu.memory_space<vmem>>, vector<8x128xf32>
    %cst = arith.constant 0.266011745 : f32
    %2 = vector.broadcast %cst : f32 to vector<8x128xf32>
    %3 = arith.mulf %2, %0 : vector<8x128xf32>
    %cst_3 = arith.constant 0.266011745 : f32
    %4 = vector.broadcast %cst_3 : f32 to vector<8x128xf32>
    %5 = arith.mulf %4, %1 : vector<8x128xf32>
    %6 = arith.mulf %0, %0 : vector<8x128xf32>
    %cst_4 = arith.constant 0.266011745 : f32
    %7 = vector.broadcast %cst_4 : f32 to vector<8x128xf32>
    %8 = arith.mulf %7, %6 : vector<8x128xf32>
    %9 = arith.mulf %1, %1 : vector<8x128xf32>
    %cst_5 = arith.constant 0.266011745 : f32
    %10 = vector.broadcast %cst_5 : f32 to vector<8x128xf32>
    %11 = arith.mulf %10, %9 : vector<8x128xf32>
    %12 = arith.mulf %0, %1 : vector<8x128xf32>
    %cst_6 = arith.constant 0.266011745 : f32
    %13 = vector.broadcast %cst_6 : f32 to vector<8x128xf32>
    %14 = arith.mulf %13, %12 : vector<8x128xf32>
    %c1_i32 = arith.constant 1 : i32
    %15 = tpu.dynamic_rotate %0 by %c1_i32 dim 1 : vector<8x128xf32>, i32 -> vector<8x128xf32>
    %c127_i32 = arith.constant 127 : i32
    %16 = tpu.dynamic_rotate %0 by %c127_i32 dim 1 : vector<8x128xf32>, i32 -> vector<8x128xf32>
    %c1_i32_7 = arith.constant 1 : i32
    %17 = tpu.dynamic_rotate %1 by %c1_i32_7 dim 1 : vector<8x128xf32>, i32 -> vector<8x128xf32>
    %c127_i32_8 = arith.constant 127 : i32
    %18 = tpu.dynamic_rotate %1 by %c127_i32_8 dim 1 : vector<8x128xf32>, i32 -> vector<8x128xf32>
    %19 = arith.addf %15, %16 : vector<8x128xf32>
    %cst_9 = arith.constant 0.213005543 : f32
    %20 = vector.broadcast %cst_9 : f32 to vector<8x128xf32>
    %21 = arith.mulf %20, %19 : vector<8x128xf32>
    %22 = arith.addf %3, %21 : vector<8x128xf32>
    %23 = arith.addf %17, %18 : vector<8x128xf32>
    %cst_10 = arith.constant 0.213005543 : f32
    %24 = vector.broadcast %cst_10 : f32 to vector<8x128xf32>
    %25 = arith.mulf %24, %23 : vector<8x128xf32>
    %26 = arith.addf %5, %25 : vector<8x128xf32>
    %27 = arith.mulf %15, %15 : vector<8x128xf32>
    %28 = arith.mulf %16, %16 : vector<8x128xf32>
    %29 = arith.addf %27, %28 : vector<8x128xf32>
    %cst_11 = arith.constant 0.213005543 : f32
    %30 = vector.broadcast %cst_11 : f32 to vector<8x128xf32>
    %31 = arith.mulf %30, %29 : vector<8x128xf32>
    %32 = arith.addf %8, %31 : vector<8x128xf32>
    %33 = arith.mulf %17, %17 : vector<8x128xf32>
    %34 = arith.mulf %18, %18 : vector<8x128xf32>
    %35 = arith.addf %33, %34 : vector<8x128xf32>
    %cst_12 = arith.constant 0.213005543 : f32
    %36 = vector.broadcast %cst_12 : f32 to vector<8x128xf32>
    %37 = arith.mulf %36, %35 : vector<8x128xf32>
    %38 = arith.addf %11, %37 : vector<8x128xf32>
    %39 = arith.mulf %15, %17 : vector<8x128xf32>
    %40 = arith.mulf %16, %18 : vector<8x128xf32>
    %41 = arith.addf %39, %40 : vector<8x128xf32>
    %cst_13 = arith.constant 0.213005543 : f32
    %42 = vector.broadcast %cst_13 : f32 to vector<8x128xf32>
    %43 = arith.mulf %42, %41 : vector<8x128xf32>
    %44 = arith.addf %14, %43 : vector<8x128xf32>
    %c2_i32 = arith.constant 2 : i32
    %45 = tpu.dynamic_rotate %0 by %c2_i32 dim 1 : vector<8x128xf32>, i32 -> vector<8x128xf32>
    %c126_i32 = arith.constant 126 : i32
    %46 = tpu.dynamic_rotate %0 by %c126_i32 dim 1 : vector<8x128xf32>, i32 -> vector<8x128xf32>
    %c2_i32_14 = arith.constant 2 : i32
    %47 = tpu.dynamic_rotate %1 by %c2_i32_14 dim 1 : vector<8x128xf32>, i32 -> vector<8x128xf32>
    %c126_i32_15 = arith.constant 126 : i32
    %48 = tpu.dynamic_rotate %1 by %c126_i32_15 dim 1 : vector<8x128xf32>, i32 -> vector<8x128xf32>
    %49 = arith.addf %45, %46 : vector<8x128xf32>
    %cst_16 = arith.constant 0.109360695 : f32
    %50 = vector.broadcast %cst_16 : f32 to vector<8x128xf32>
    %51 = arith.mulf %50, %49 : vector<8x128xf32>
    %52 = arith.addf %22, %51 : vector<8x128xf32>
    %53 = arith.addf %47, %48 : vector<8x128xf32>
    %cst_17 = arith.constant 0.109360695 : f32
    %54 = vector.broadcast %cst_17 : f32 to vector<8x128xf32>
    %55 = arith.mulf %54, %53 : vector<8x128xf32>
    %56 = arith.addf %26, %55 : vector<8x128xf32>
    %57 = arith.mulf %45, %45 : vector<8x128xf32>
    %58 = arith.mulf %46, %46 : vector<8x128xf32>
    %59 = arith.addf %57, %58 : vector<8x128xf32>
    %cst_18 = arith.constant 0.109360695 : f32
    %60 = vector.broadcast %cst_18 : f32 to vector<8x128xf32>
    %61 = arith.mulf %60, %59 : vector<8x128xf32>
    %62 = arith.addf %32, %61 : vector<8x128xf32>
    %63 = arith.mulf %47, %47 : vector<8x128xf32>
    %64 = arith.mulf %48, %48 : vector<8x128xf32>
    %65 = arith.addf %63, %64 : vector<8x128xf32>
    %cst_19 = arith.constant 0.109360695 : f32
    %66 = vector.broadcast %cst_19 : f32 to vector<8x128xf32>
    %67 = arith.mulf %66, %65 : vector<8x128xf32>
    %68 = arith.addf %38, %67 : vector<8x128xf32>
    %69 = arith.mulf %45, %47 : vector<8x128xf32>
    %70 = arith.mulf %46, %48 : vector<8x128xf32>
    %71 = arith.addf %69, %70 : vector<8x128xf32>
    %cst_20 = arith.constant 0.109360695 : f32
    %72 = vector.broadcast %cst_20 : f32 to vector<8x128xf32>
    %73 = arith.mulf %72, %71 : vector<8x128xf32>
    %74 = arith.addf %44, %73 : vector<8x128xf32>
    %c3_i32 = arith.constant 3 : i32
    %75 = tpu.dynamic_rotate %0 by %c3_i32 dim 1 : vector<8x128xf32>, i32 -> vector<8x128xf32>
    %c125_i32 = arith.constant 125 : i32
    %76 = tpu.dynamic_rotate %0 by %c125_i32 dim 1 : vector<8x128xf32>, i32 -> vector<8x128xf32>
    %c3_i32_21 = arith.constant 3 : i32
    %77 = tpu.dynamic_rotate %1 by %c3_i32_21 dim 1 : vector<8x128xf32>, i32 -> vector<8x128xf32>
    %c125_i32_22 = arith.constant 125 : i32
    %78 = tpu.dynamic_rotate %1 by %c125_i32_22 dim 1 : vector<8x128xf32>, i32 -> vector<8x128xf32>
    %79 = arith.addf %75, %76 : vector<8x128xf32>
    %cst_23 = arith.constant 0.0360007733 : f32
    %80 = vector.broadcast %cst_23 : f32 to vector<8x128xf32>
    %81 = arith.mulf %80, %79 : vector<8x128xf32>
    %82 = arith.addf %52, %81 : vector<8x128xf32>
    %83 = arith.addf %77, %78 : vector<8x128xf32>
    %cst_24 = arith.constant 0.0360007733 : f32
    %84 = vector.broadcast %cst_24 : f32 to vector<8x128xf32>
    %85 = arith.mulf %84, %83 : vector<8x128xf32>
    %86 = arith.addf %56, %85 : vector<8x128xf32>
    %87 = arith.mulf %75, %75 : vector<8x128xf32>
    %88 = arith.mulf %76, %76 : vector<8x128xf32>
    %89 = arith.addf %87, %88 : vector<8x128xf32>
    %cst_25 = arith.constant 0.0360007733 : f32
    %90 = vector.broadcast %cst_25 : f32 to vector<8x128xf32>
    %91 = arith.mulf %90, %89 : vector<8x128xf32>
    %92 = arith.addf %62, %91 : vector<8x128xf32>
    %93 = arith.mulf %77, %77 : vector<8x128xf32>
    %94 = arith.mulf %78, %78 : vector<8x128xf32>
    %95 = arith.addf %93, %94 : vector<8x128xf32>
    %cst_26 = arith.constant 0.0360007733 : f32
    %96 = vector.broadcast %cst_26 : f32 to vector<8x128xf32>
    %97 = arith.mulf %96, %95 : vector<8x128xf32>
    %98 = arith.addf %68, %97 : vector<8x128xf32>
    %99 = arith.mulf %75, %77 : vector<8x128xf32>
    %100 = arith.mulf %76, %78 : vector<8x128xf32>
    %101 = arith.addf %99, %100 : vector<8x128xf32>
    %cst_27 = arith.constant 0.0360007733 : f32
    %102 = vector.broadcast %cst_27 : f32 to vector<8x128xf32>
    %103 = arith.mulf %102, %101 : vector<8x128xf32>
    %104 = arith.addf %74, %103 : vector<8x128xf32>
    %c4_i32 = arith.constant 4 : i32
    %105 = tpu.dynamic_rotate %0 by %c4_i32 dim 1 : vector<8x128xf32>, i32 -> vector<8x128xf32>
    %c124_i32 = arith.constant 124 : i32
    %106 = tpu.dynamic_rotate %0 by %c124_i32 dim 1 : vector<8x128xf32>, i32 -> vector<8x128xf32>
    %c4_i32_28 = arith.constant 4 : i32
    %107 = tpu.dynamic_rotate %1 by %c4_i32_28 dim 1 : vector<8x128xf32>, i32 -> vector<8x128xf32>
    %c124_i32_29 = arith.constant 124 : i32
    %108 = tpu.dynamic_rotate %1 by %c124_i32_29 dim 1 : vector<8x128xf32>, i32 -> vector<8x128xf32>
    %109 = arith.addf %105, %106 : vector<8x128xf32>
    %cst_30 = arith.constant 0.00759875868 : f32
    %110 = vector.broadcast %cst_30 : f32 to vector<8x128xf32>
    %111 = arith.mulf %110, %109 : vector<8x128xf32>
    %112 = arith.addf %82, %111 : vector<8x128xf32>
    %113 = arith.addf %107, %108 : vector<8x128xf32>
    %cst_31 = arith.constant 0.00759875868 : f32
    %114 = vector.broadcast %cst_31 : f32 to vector<8x128xf32>
    %115 = arith.mulf %114, %113 : vector<8x128xf32>
    %116 = arith.addf %86, %115 : vector<8x128xf32>
    %117 = arith.mulf %105, %105 : vector<8x128xf32>
    %118 = arith.mulf %106, %106 : vector<8x128xf32>
    %119 = arith.addf %117, %118 : vector<8x128xf32>
    %cst_32 = arith.constant 0.00759875868 : f32
    %120 = vector.broadcast %cst_32 : f32 to vector<8x128xf32>
    %121 = arith.mulf %120, %119 : vector<8x128xf32>
    %122 = arith.addf %92, %121 : vector<8x128xf32>
    %123 = arith.mulf %107, %107 : vector<8x128xf32>
    %124 = arith.mulf %108, %108 : vector<8x128xf32>
    %125 = arith.addf %123, %124 : vector<8x128xf32>
    %cst_33 = arith.constant 0.00759875868 : f32
    %126 = vector.broadcast %cst_33 : f32 to vector<8x128xf32>
    %127 = arith.mulf %126, %125 : vector<8x128xf32>
    %128 = arith.addf %98, %127 : vector<8x128xf32>
    %129 = arith.mulf %105, %107 : vector<8x128xf32>
    %130 = arith.mulf %106, %108 : vector<8x128xf32>
    %131 = arith.addf %129, %130 : vector<8x128xf32>
    %cst_34 = arith.constant 0.00759875868 : f32
    %132 = vector.broadcast %cst_34 : f32 to vector<8x128xf32>
    %133 = arith.mulf %132, %131 : vector<8x128xf32>
    %134 = arith.addf %104, %133 : vector<8x128xf32>
    %c5_i32 = arith.constant 5 : i32
    %135 = tpu.dynamic_rotate %0 by %c5_i32 dim 1 : vector<8x128xf32>, i32 -> vector<8x128xf32>
    %c123_i32 = arith.constant 123 : i32
    %136 = tpu.dynamic_rotate %0 by %c123_i32 dim 1 : vector<8x128xf32>, i32 -> vector<8x128xf32>
    %c5_i32_35 = arith.constant 5 : i32
    %137 = tpu.dynamic_rotate %1 by %c5_i32_35 dim 1 : vector<8x128xf32>, i32 -> vector<8x128xf32>
    %c123_i32_36 = arith.constant 123 : i32
    %138 = tpu.dynamic_rotate %1 by %c123_i32_36 dim 1 : vector<8x128xf32>, i32 -> vector<8x128xf32>
    %139 = arith.addf %135, %136 : vector<8x128xf32>
    %cst_37 = arith.constant 0.00102838024 : f32
    %140 = vector.broadcast %cst_37 : f32 to vector<8x128xf32>
    %141 = arith.mulf %140, %139 : vector<8x128xf32>
    %142 = arith.addf %112, %141 : vector<8x128xf32>
    %143 = arith.addf %137, %138 : vector<8x128xf32>
    %cst_38 = arith.constant 0.00102838024 : f32
    %144 = vector.broadcast %cst_38 : f32 to vector<8x128xf32>
    %145 = arith.mulf %144, %143 : vector<8x128xf32>
    %146 = arith.addf %116, %145 : vector<8x128xf32>
    %147 = arith.mulf %135, %135 : vector<8x128xf32>
    %148 = arith.mulf %136, %136 : vector<8x128xf32>
    %149 = arith.addf %147, %148 : vector<8x128xf32>
    %cst_39 = arith.constant 0.00102838024 : f32
    %150 = vector.broadcast %cst_39 : f32 to vector<8x128xf32>
    %151 = arith.mulf %150, %149 : vector<8x128xf32>
    %152 = arith.addf %122, %151 : vector<8x128xf32>
    %153 = arith.mulf %137, %137 : vector<8x128xf32>
    %154 = arith.mulf %138, %138 : vector<8x128xf32>
    %155 = arith.addf %153, %154 : vector<8x128xf32>
    %cst_40 = arith.constant 0.00102838024 : f32
    %156 = vector.broadcast %cst_40 : f32 to vector<8x128xf32>
    %157 = arith.mulf %156, %155 : vector<8x128xf32>
    %158 = arith.addf %128, %157 : vector<8x128xf32>
    %159 = arith.mulf %135, %137 : vector<8x128xf32>
    %160 = arith.mulf %136, %138 : vector<8x128xf32>
    %161 = arith.addf %159, %160 : vector<8x128xf32>
    %cst_41 = arith.constant 0.00102838024 : f32
    %162 = vector.broadcast %cst_41 : f32 to vector<8x128xf32>
    %163 = arith.mulf %162, %161 : vector<8x128xf32>
    %164 = arith.addf %134, %163 : vector<8x128xf32>
    %165 = arith.mulf %142, %142 : vector<8x128xf32>
    %166 = arith.mulf %146, %146 : vector<8x128xf32>
    %167 = arith.mulf %142, %146 : vector<8x128xf32>
    %168 = arith.subf %152, %165 : vector<8x128xf32>
    %169 = arith.subf %158, %166 : vector<8x128xf32>
    %170 = arith.subf %164, %167 : vector<8x128xf32>
    %cst_42 = arith.constant 2.000000e+00 : f32
    %171 = vector.broadcast %cst_42 : f32 to vector<8x128xf32>
    %172 = arith.mulf %171, %167 : vector<8x128xf32>
    %cst_43 = arith.constant 9.99999974E-5 : f32
    %173 = vector.broadcast %cst_43 : f32 to vector<8x128xf32>
    %174 = arith.addf %172, %173 : vector<8x128xf32>
    %cst_44 = arith.constant 2.000000e+00 : f32
    %175 = vector.broadcast %cst_44 : f32 to vector<8x128xf32>
    %176 = arith.mulf %175, %170 : vector<8x128xf32>
    %cst_45 = arith.constant 8.99999984E-4 : f32
    %177 = vector.broadcast %cst_45 : f32 to vector<8x128xf32>
    %178 = arith.addf %176, %177 : vector<8x128xf32>
    %179 = arith.mulf %174, %178 : vector<8x128xf32>
    %180 = arith.addf %165, %166 : vector<8x128xf32>
    %cst_46 = arith.constant 9.99999974E-5 : f32
    %181 = vector.broadcast %cst_46 : f32 to vector<8x128xf32>
    %182 = arith.addf %180, %181 : vector<8x128xf32>
    %183 = arith.addf %168, %169 : vector<8x128xf32>
    %cst_47 = arith.constant 8.99999984E-4 : f32
    %184 = vector.broadcast %cst_47 : f32 to vector<8x128xf32>
    %185 = arith.addf %183, %184 : vector<8x128xf32>
    %186 = arith.mulf %182, %185 : vector<8x128xf32>
    %187 = tpu.reciprocal %186 {approx = true} : vector<8x128xf32> -> vector<8x128xf32>
    %188 = arith.mulf %186, %187 : vector<8x128xf32>
    %cst_48 = arith.constant 2.000000e+00 : f32
    %189 = vector.broadcast %cst_48 : f32 to vector<8x128xf32>
    %190 = arith.subf %189, %188 : vector<8x128xf32>
    %191 = arith.mulf %187, %190 : vector<8x128xf32>
    %192 = arith.mulf %179, %191 : vector<8x128xf32>
    %193 = tpu.iota {dimensions = array<i32: 1>} : vector<1x128xi32>
    %c16_i32 = arith.constant 16 : i32
    %194 = vector.broadcast %c16_i32 : i32 to vector<1x128xi32>
    %195 = arith.cmpi slt, %193, %194 : vector<1x128xi32>
    %196 = arith.extui %195 : vector<1x128xi1> to vector<1x128xi32>
    %197 = arith.sitofp %196 : vector<1x128xi32> to vector<1x128xf32>
    %198 = vector.broadcast %197 : vector<1x128xf32> to vector<8x128xf32>
    %199 = arith.mulf %192, %198 : vector<8x128xf32>
    %cst_49 = arith.constant dense<0.000000e+00> : vector<128xf32>
    %200 = vector.multi_reduction <add>, %199, %cst_49 [0] : vector<8x128xf32> to vector<128xf32>
    %201 = vector.shape_cast %200 : vector<128xf32> to vector<1x128xf32>
    %202 = vector.shape_cast %201 : vector<1x128xf32> to vector<1x1x128xf32>
    %cst_50 = arith.constant dense<0.000000e+00> : vector<1xf32>
    %203 = vector.multi_reduction <add>, %202, %cst_50 [1, 2] : vector<1x1x128xf32> to vector<1xf32>
    %204 = vector.shape_cast %203 : vector<1xf32> to vector<1x1x1xf32>
    %205 = vector.extract %204[0, 0, 0] : f32 from vector<1x1x1xf32>
    %206 = vector.broadcast %205 : f32 to vector<1x1x128xf32>
    %c0_51 = arith.constant 0 : index
    %c0_52 = arith.constant 0 : index
    %c0_53 = arith.constant 0 : index
    %207 = vector.load %arg3[%c0_51, %c0_52, %c0_53] : memref<1x1x128xf32, #tpu.memory_space<vmem>>, vector<1x1x128xf32>
    tpu.vector_store %arg3[%c0_51, %c0_52, %c0_53], %206 {strides = array<i32>} : memref<1x1x128xf32, #tpu.memory_space<vmem>>, vector<1x1x128xf32>,
    return
  }
  func.func @transform_0(%arg0: i32) -> (i32, i32) {
    %c0_i32 = arith.constant 0 : i32
    %c0_i32_0 = arith.constant 0 : i32
    return %arg0, %c0_i32 : i32, i32
  }
  func.func @transform_1(%arg0: i32) -> (i32, i32) {
    %c0_i32 = arith.constant 0 : i32
    %c0_i32_0 = arith.constant 0 : i32
    return %arg0, %c0_i32 : i32, i32
  }
  func.func @transform_2(%arg0: i32) -> (i32, i32, i32) {
    %c0_i32 = arith.constant 0 : i32
    %c0_i32_0 = arith.constant 0 : i32
    %c0_i32_1 = arith.constant 0 : i32
    return %arg0, %c0_i32, %c0_i32_0 : i32, i32, i32
  }
}

</mosaic_0001>

<bundles_post_ra>
// kernel: tpu_custom_call.1
= control target key start
LH: loop header
LB: loop body
LE: loop exit
PB: predicated region body
PF: predicated region fallthrough
CT: control target
= control target key end

     0   :  { %7 = vsyncpa [#allocation3], 0  ;;  %s379_s0 = inlined_call_operand.hbm [shape: f32[8,128], index: 0, kind: input, shape index: {}]   ;;  %s380_s1 = inlined_call_operand.hbm [shape: f32[8,128], index: 1, kind: input, shape index: {}]   ;;  %s381_s2 = inlined_call_operand.hbm [shape: f32[1,1,128], index: 2, kind: output, shape index: {}]  }
   0x1   :  { %8 = vsyncpa [#allocation6], 0 }
   0x2   :  { %9 = vsyncpa [#allocation4], 0  ;;  %s338_s9 = smov [#allocation2]   ;;  %s339_s11 = smov [#allocation5]  }
   0x3   :  { %s16_s10 = sshll.u32 %s338_s9, 4  ;;  %s26_s12 = sshll.u32 %s339_s11, 4  ;;  %s17_s10 = int_to_ptr.vmem [resolvable:$true] %s16_s10  ;;  %s27_s12 = int_to_ptr.vmem [resolvable:$true] %s26_s12 }
   0x4   :  { %s280_s13 = scalar_lea.vmem %s17_s10, 128  ;;  %p285_p1 = scmp.lt.s32.totalorder %s17_s10, %s17_s10 }
   0x5   :  { %p281_p0 = scmp.ne.s32.totalorder %s17_s10, %s280_s13  ;;  %p286_p2 = scmp.lt.s32.totalorder %s280_s13, %s280_s13 }
   0x7   :  { %p287_p3 = por %p286_p2, %p285_p1 }
   0x9   :  { %p288_p4 = pnand %p287_p3, %p281_p0 }
   0xb   :  { %291 = shalt.err (!%p288_p4)
}
   0xc   :  { %19 = dma.hbm_to_vmem [thread:$0]  %s379_s0, 128, %s17_s10, [#allocation3]  }
   0xd   :  { %s300_s16 = scalar_lea.vmem %s27_s12, 128  ;;  %p305_p6 = scmp.lt.s32.totalorder %s27_s12, %s27_s12 }
   0xe   :  { %p301_p5 = scmp.ne.s32.totalorder %s27_s12, %s300_s16  ;;  %p306_p7 = scmp.lt.s32.totalorder %s300_s16, %s300_s16 }
  0x10   :  { %p307_p8 = por %p306_p7, %p305_p6 }
  0x12   :  { %p308_p9 = pnand %p307_p8, %p301_p5 }
  0x14   :  { %311 = shalt.err (!%p308_p9)
}
  0x15   :  { %29 = dma.hbm_to_vmem [thread:$0]  %s380_s1, 128, %s27_s12, [#allocation6]  }
  0x16   :  { %332 = dma.done.wait [#allocation3], 128  }
  0x17   :  { %333 = vsyncadd [#allocation3], 4294967168 }
  0x18   :  { %334 = dma.done.wait [#allocation6], 128  }
  0x19   :  { %335 = vsyncadd [#allocation6], 4294967168  ;;  %v36_v0 = vld [vmem:[#allocation2] sm:$0xff]  ;;  %v37_v1 = vld [vmem:[#allocation5] sm:$0xff]  ;;  %s340_s19 = smov 1   ;;  %s341_s0 = smov 127  }
  0x1a   :  { %50 = vrot.lane.b32.xlu1 %v37_v1, %s340_s19  ;;  %46 = vrot.lane.b32.xlu0 %v36_v0, %s340_s19  ;;  %v373_v2 = vmul.f32 %v37_v1, %v36_v0  ;;  %s342_s20 = smov 126   ;;  %s343_s21 = smov 2   ;;  %v42_v15 = vmul.f32 %v37_v1, %v37_v1  ;;  %v40_v17 = vmul.f32 %v36_v0, %v36_v0  ;;  %v39_v27 = vmul.f32 0.26601174, %v37_v1 }
  0x1b   :  { %s344_s1 = smov 125   ;;  %s345_s22 = smov 3   ;;  %v38_v29 = vmul.f32 0.26601174, %v36_v0  ;;  %vm224_vm1 = vcmask 1040384  }
  0x1c   :  { %s346_s23 = smov 124   ;;  %s347_s24 = smov 4   ;;  %v43_v28 = vmul.f32 0.26601174, %v42_v15  ;;  %v41_v31 = vmul.f32 0.26601174, %v40_v17 }
  0x1d   :  { %s348_s25 = smov 123   ;;  %s349_s26 = smov 5   ;;  %v45_v45 = vmul.f32 0.26601174, %v373_v2 }
  0x1e   :  { %52 = vrot.lane.b32.xlu1 %v37_v1, %s341_s0  ;;  %48 = vrot.lane.b32.xlu0 %v36_v0, %s341_s0  ;;  %s351_s27 = smov [#allocation7]  }
  0x1f   :  { %s243_s28 = sshll.u32 %s351_s27, 4  ;;  %s244_s28 = int_to_ptr.vmem [resolvable:$true] %s243_s28 }
  0x20   :  { %s312_s30 = scalar_lea.vmem %s244_s28, 16  ;;  %s316_s3 = scalar_lea.vmem %s244_s28, 32 }
  0x21   :  { %p313_p10 = scmp.ne.s32.totalorder %s244_s28, %s312_s30  ;;  %p317_p11 = scmp.lt.s32.totalorder %s244_s28, %s244_s28 }
  0x22   :  { %77 = vrot.lane.b32.xlu1 %v36_v0, %s342_s20  ;;  %75 = vrot.lane.b32.xlu0 %v36_v0, %s343_s21  ;;  %p318_p12 = scmp.lt.s32.totalorder %s316_s3, %s312_s30 }
  0x24   :  { %p319_p13 = por %p318_p12, %p317_p11 }
  0x26   :  { %81 = vrot.lane.b32.xlu1 %v37_v1, %s342_s20  ;;  %79 = vrot.lane.b32.xlu0 %v37_v1, %s343_s21  ;;  %p320_p0 = pnand %p319_p13, %p313_p10 }
  0x2a   :  { %106 = vrot.lane.b32.xlu1 %v36_v0, %s344_s1  ;;  %104 = vrot.lane.b32.xlu0 %v36_v0, %s345_s22 }
  0x2e   :  { %110 = vrot.lane.b32.xlu1 %v37_v1, %s344_s1  ;;  %108 = vrot.lane.b32.xlu0 %v37_v1, %s345_s22 }
  0x32   :  { %135 = vrot.lane.b32.xlu1 %v36_v0, %s346_s23  ;;  %133 = vrot.lane.b32.xlu0 %v36_v0, %s347_s24 }
  0x36   :  { %139 = vrot.lane.b32.xlu1 %v37_v1, %s346_s23  ;;  %137 = vrot.lane.b32.xlu0 %v37_v1, %s347_s24 }
  0x3a   :  { %164 = vrot.lane.b32.xlu1 %v36_v0, %s348_s25  ;;  %162 = vrot.lane.b32.xlu0 %v36_v0, %s349_s26 }
  0x3e   :  { %168 = vrot.lane.b32.xlu1 %v37_v1, %s348_s25  ;;  %166 = vrot.lane.b32.xlu0 %v37_v1, %s349_s26 }
  0x8c   :  { %v51_v3 = vpop.permute.xlu1 %50  ;;  %v47_v4 = vpop.permute.xlu0 %46 }
  0x8d   :  { %v65_v13 = vmul.f32 %v51_v3, %v51_v3  ;;  %v60_v14 = vmul.f32 %v47_v4, %v47_v4  ;;  %v70_v22 = vmul.f32 %v51_v3, %v47_v4 }
  0x90   :  { %v53_v5 = vpop.permute.xlu1 %52  ;;  %v49_v6 = vpop.permute.xlu0 %48 }
  0x91   :  { %v66_v9 = vmul.f32 %v53_v5, %v53_v5  ;;  %v61_v10 = vmul.f32 %v49_v6, %v49_v6  ;;  %v57_v16 = vadd.f32 %v53_v5, %v51_v3  ;;  %v54_v18 = vadd.f32 %v49_v6, %v47_v4 }
  0x92   :  { %v71_v19 = vmul.f32 %v53_v5, %v49_v6 }
  0x93   :  { %v67_v20 = vadd.f32 %v66_v9, %v65_v13  ;;  %v62_v21 = vadd.f32 %v61_v10, %v60_v14  ;;  %v58_v30 = vmul.f32 0.21300554, %v57_v16  ;;  %v55_v32 = vmul.f32 0.21300554, %v54_v18 }
  0x94   :  { %v78_v7 = vpop.permute.xlu1 %77  ;;  %v76_v8 = vpop.permute.xlu0 %75  ;;  %v72_v33 = vadd.f32 %v71_v19, %v70_v22 }
  0x95   :  { %v90_v23 = vmul.f32 %v78_v7, %v78_v7  ;;  %v89_v24 = vmul.f32 %v76_v8, %v76_v8  ;;  %v68_v34 = vmul.f32 0.21300554, %v67_v20  ;;  %v63_v35 = vmul.f32 0.21300554, %v62_v21 }
  0x96   :  { %v83_v38 = vadd.f32 %v78_v7, %v76_v8  ;;  %v59_v44 = vadd.f32 %v58_v30, %v39_v27  ;;  %v73_v46 = vmul.f32 0.21300554, %v72_v33  ;;  %v56_v49 = vadd.f32 %v55_v32, %v38_v29 }
  0x97   :  { %v91_v39 = vadd.f32 %v90_v23, %v89_v24  ;;  %v69_v48 = vadd.f32 %v68_v34, %v43_v28  ;;  %v64_v50 = vadd.f32 %v63_v35, %v41_v31 }
  0x98   :  { %v82_v11 = vpop.permute.xlu1 %81  ;;  %v80_v12 = vpop.permute.xlu0 %79  ;;  %v84_v52 = vmul.f32 0.109360695, %v83_v38  ;;  %v74_v62 = vadd.f32 %v73_v46, %v45_v45 }
  0x99   :  { %v95_v36 = vmul.f32 %v82_v11, %v82_v11  ;;  %v94_v37 = vmul.f32 %v80_v12, %v80_v12  ;;  %v100_v42 = vmul.f32 %v82_v11, %v78_v7  ;;  %v99_v43 = vmul.f32 %v80_v12, %v76_v8 }
  0x9a   :  { %v86_v47 = vadd.f32 %v82_v11, %v80_v12  ;;  %v92_v53 = vmul.f32 0.109360695, %v91_v39  ;;  %v85_v6 = vadd.f32 %v84_v52, %v56_v49 }
  0x9b   :  { %v96_v51 = vadd.f32 %v95_v36, %v94_v37  ;;  %v101_v58 = vadd.f32 %v100_v42, %v99_v43 }
  0x9c   :  { %v107_v25 = vpop.permute.xlu1 %106  ;;  %v105_v26 = vpop.permute.xlu0 %104  ;;  %v87_v63 = vmul.f32 0.109360695, %v86_v47  ;;  %v93_v7 = vadd.f32 %v92_v53, %v64_v50 }
  0x9d   :  { %v119_v54 = vmul.f32 %v107_v25, %v107_v25  ;;  %v118_v55 = vmul.f32 %v105_v26, %v105_v26  ;;  %v112_v59 = vadd.f32 %v107_v25, %v105_v26  ;;  %v97_v2 = vmul.f32 0.109360695, %v96_v51 }
  0x9e   :  { %v102_v12 = vmul.f32 0.109360695, %v101_v58  ;;  %v88_v20 = vadd.f32 %v87_v63, %v59_v44 }
  0x9f   :  { %v120_v8 = vadd.f32 %v119_v54, %v118_v55  ;;  %v113_v13 = vmul.f32 0.036000773, %v112_v59  ;;  %v98_v21 = vadd.f32 %v97_v2, %v69_v48 }
  0xa0   :  { %v111_v40 = vpop.permute.xlu1 %110  ;;  %v109_v41 = vpop.permute.xlu0 %108  ;;  %v103_v34 = vadd.f32 %v102_v12, %v74_v62 }
  0xa1   :  { %v124_v60 = vmul.f32 %v111_v40, %v111_v40  ;;  %v123_v61 = vmul.f32 %v109_v41, %v109_v41  ;;  %v129_v0 = vmul.f32 %v111_v40, %v107_v25  ;;  %v128_v1 = vmul.f32 %v109_v41, %v105_v26 }
  0xa2   :  { %v115_v9 = vadd.f32 %v111_v40, %v109_v41  ;;  %v121_v24 = vmul.f32 0.036000773, %v120_v8  ;;  %v114_v30 = vadd.f32 %v113_v13, %v85_v6 }
  0xa3   :  { %v125_v14 = vadd.f32 %v124_v60, %v123_v61  ;;  %v130_v16 = vadd.f32 %v129_v0, %v128_v1 }
  0xa4   :  { %v136_v56 = vpop.permute.xlu1 %135  ;;  %v134_v57 = vpop.permute.xlu0 %133  ;;  %v116_v25 = vmul.f32 0.036000773, %v115_v9  ;;  %v122_v42 = vadd.f32 %v121_v24, %v93_v7 }
  0xa5   :  { %v148_v3 = vmul.f32 %v136_v56, %v136_v56  ;;  %v141_v4 = vadd.f32 %v136_v56, %v134_v57  ;;  %v147_v5 = vmul.f32 %v134_v57, %v134_v57  ;;  %v126_v35 = vmul.f32 0.036000773, %v125_v14 }
  0xa6   :  { %v131_v36 = vmul.f32 0.036000773, %v130_v16  ;;  %v117_v43 = vadd.f32 %v116_v25, %v88_v20 }
  0xa7   :  { %v142_v22 = vmul.f32 0.0075987587, %v141_v4  ;;  %v149_v23 = vadd.f32 %v148_v3, %v147_v5 }
  0xa8   :  { %v140_v10 = vpop.permute.xlu1 %139  ;;  %v138_v11 = vpop.permute.xlu0 %137 }
  0xa9   :  { %v153_v15 = vmul.f32 %v140_v10, %v140_v10  ;;  %v158_v17 = vmul.f32 %v140_v10, %v136_v56  ;;  %v152_v18 = vmul.f32 %v138_v11, %v138_v11  ;;  %v157_v19 = vmul.f32 %v138_v11, %v134_v57 }
  0xaa   :  { %v144_v26 = vadd.f32 %v140_v10, %v138_v11  ;;  %v143_v38 = vadd.f32 %v142_v22, %v114_v30  ;;  %v150_v39 = vmul.f32 0.0075987587, %v149_v23  ;;  %v127_v56 = vadd.f32 %v126_v35, %v98_v21 }
  0xab   :  { %v154_v27 = vadd.f32 %v153_v15, %v152_v18  ;;  %v159_v37 = vadd.f32 %v158_v17, %v157_v19  ;;  %v132_v57 = vadd.f32 %v131_v36, %v103_v34  ;;  %v212_v23 = vlaneseq }
  0xac   :  { %v165_v28 = vpop.permute.xlu1 %164  ;;  %v163_v29 = vpop.permute.xlu0 %162  ;;  %v145_v44 = vmul.f32 0.0075987587, %v144_v26  ;;  %v151_v58 = vadd.f32 %v150_v39, %v122_v42 }
  0xad   :  { %v177_v31 = vmul.f32 %v165_v28, %v165_v28  ;;  %v170_v32 = vadd.f32 %v165_v28, %v163_v29  ;;  %v176_v33 = vmul.f32 %v163_v29, %v163_v29  ;;  %v155_v45 = vmul.f32 0.0075987587, %v154_v27 }
  0xae   :  { %v160_v52 = vmul.f32 0.0075987587, %v159_v37  ;;  %v146_v59 = vadd.f32 %v145_v44, %v117_v43  ;;  %v213_v24 = vand.u32 127, %v212_v23 }
  0xaf   :  { %v171_v40 = vmul.f32 0.0010283802, %v170_v32  ;;  %v178_v41 = vadd.f32 %v177_v31, %v176_v33  ;;  %v156_v63 = vadd.f32 %v155_v45, %v127_v56 }
  0xb0   :  { %v169_v46 = vpop.permute.xlu1 %168  ;;  %v167_v47 = vpop.permute.xlu0 %166  ;;  %v161_v2 = vadd.f32 %v160_v52, %v132_v57  ;;  %vm214_vm0 = vcmp.lt.s32.totalorder %v213_v24, 16 }
  0xb1   :  { %v172_v48 = vadd.f32 %v171_v40, %v143_v38  ;;  %v179_v49 = vmul.f32 0.0010283802, %v178_v41  ;;  %v182_v50 = vmul.f32 %v169_v46, %v169_v46  ;;  %v187_v51 = vmul.f32 %v169_v46, %v165_v28 }
  0xb2   :  { %v173_v53 = vadd.f32 %v169_v46, %v167_v47  ;;  %v181_v54 = vmul.f32 %v167_v47, %v167_v47  ;;  %v186_v55 = vmul.f32 %v167_v47, %v163_v29  ;;  %v350_v29 = vmov 0.0  }
  0xb3   :  { %v180_v0 = vadd.f32 %v179_v49, %v151_v58  ;;  %v191_v1 = vmul.f32 %v172_v48, %v172_v48  ;;  %v253_v30 = vsel %vm214_vm0, 1.0, %v350_v29 }
  0xb4   :  { %v174_v60 = vmul.f32 0.0010283802, %v173_v53  ;;  %v183_v61 = vadd.f32 %v182_v50, %v181_v54  ;;  %v188_v62 = vadd.f32 %v187_v51, %v186_v55 }
  0xb5   :  { %v194_v10 = vsub.f32 %v180_v0, %v191_v1 }
  0xb6   :  { %v175_v3 = vadd.f32 %v174_v60, %v146_v59  ;;  %v184_v4 = vmul.f32 0.0010283802, %v183_v61  ;;  %v189_v5 = vmul.f32 0.0010283802, %v188_v62 }
  0xb8   :  { %v185_v6 = vadd.f32 %v184_v4, %v156_v63  ;;  %v190_v7 = vadd.f32 %v189_v5, %v161_v2  ;;  %v192_v8 = vmul.f32 %v175_v3, %v175_v3  ;;  %v193_v9 = vmul.f32 %v175_v3, %v172_v48 }
  0xba   :  { %v195_v11 = vsub.f32 %v185_v6, %v192_v8  ;;  %v196_v12 = vsub.f32 %v190_v7, %v193_v9  ;;  %v197_v13 = vmul.f32 2.0, %v193_v9  ;;  %v202_v14 = vadd.f32 %v192_v8, %v191_v1 }
  0xbc   :  { %v199_v15 = vmul.f32 2.0, %v196_v12  ;;  %v204_v16 = vadd.f32 %v195_v11, %v194_v10  ;;  %v198_v17 = vadd.f32 0.0001, %v197_v13  ;;  %v203_v19 = vadd.f32 0.0001, %v202_v14 }
  0xbe   :  { %v200_v18 = vadd.f32 0.0009, %v199_v15  ;;  %v205_v20 = vadd.f32 0.0009, %v204_v16 }
  0xc0   :  { %v206_v21 = vmul.f32 %v205_v20, %v203_v19  ;;  %v201_v22 = vmul.f32 %v200_v18, %v198_v17 }
  0xc2   :  { %270 = vrcp.f32 %v206_v21 }
  0xcf   :  { %v271_v25 = vpop.eup %270 }
  0xd0   :  { %v208_v26 = vmul.f32 %v271_v25, %v206_v21 }
  0xd2   :  { %v209_v27 = vsub.f32 2.0, %v208_v26 }
  0xd4   :  { %v210_v28 = vmul.f32 %v271_v25, %v209_v27 }
  0xd6   :  { %v211_v31 = vmul.f32 %v210_v28, %v201_v22 }
  0xd8   :  { %v217_v32 = vmul.f32 %v253_v30, %v211_v31 }
  0xda   :  { %v218_v33 = vrot.slane %v217_v32, 4 }
  0xdc   :  { %v219_v34 = vadd.f32 %v218_v33, %v217_v32 }
  0xde   :  { %v220_v35 = vrot.slane %v219_v34, 2 }
  0xe0   :  { %v221_v36 = vadd.f32 %v220_v35, %v219_v34 }
  0xe2   :  { %v222_v37 = vrot.slane %v221_v36, 1 }
  0xe4   :  { %v223_v38 = vadd.f32 %v222_v37, %v221_v36 }
  0xe6   :  { %v225_v39 = vsel %vm224_vm1, %v223_v38, 0.0 }
  0xe7   :  { %226 = vadd.xlane.f32.xlu0 %v225_v39 }
 0x170   :  { %v227_v40 = vpop.xlane.xlu0 %226 }
 0x171   :  { %v228_v41 = vrot.slane %v227_v40, 4 }
 0x173   :  { %v229_v42 = vadd.f32 %v228_v41, %v227_v40 }
 0x175   :  { %v230_v43 = vrot.slane %v229_v42, 2 }
 0x177   :  { %v231_v44 = vadd.f32 %v230_v43, %v229_v42 }
 0x179   :  { %v232_v45 = vrot.slane %v231_v44, 1 }
 0x17b   :  { %v233_v46 = vadd.f32 %v232_v45, %v231_v44 }
 0x17d   :  { %254 = vpush %v233_v46 }
 0x1ae   :  { %s255_s29 = spop %254 }
 0x1af   :  { %v235_v47 = vstv %s255_s29 }
 0x1b0   :  { %236 = vst [vmem:[#allocation7] sm:$0x1] %v235_v47 }
 0x1b1   :  { %323 = shalt.err (!%p320_p0)
}
 0x1b2   :  { %246 = dma.vmem_to_hbm [thread:$0]  %s244_s28, 16, %s381_s2, [#allocation4]  }
 0x1b3   :  { %336 = dma.done.wait [#allocation4], 16  }
 0x1b4   :  { %337 = vsyncadd [#allocation4], 4294967280 }
 0x1b5   :  { %250 = vsyncpa [#allocation3], 1 }
 0x1b6   :  { %251 = vsyncpa [#allocation6], 1 }
 0x1b7   :  { %252 = vsyncpa [#allocation4], 1 }

</bundles_post_ra>
